<compile_context>
chip_gen: v7x
topology: tpu7x:2x2x1
jax: 0.10.0
libtpu: 0.0.40
codegen_flags: <defaults>
</compile_context>

<pallas_src>
import functools

import jax
import jax.numpy as jnp
from jax import lax
from jax.experimental import pallas as pl
from jax.experimental.pallas import tpu as pltpu


def _round_up(value, multiple):
    return (value + multiple - 1) // multiple * multiple


def _choose_tile_batch(batch, tile_batch):
    """Pick a batch-tile size: multiple of 256, large, >=2 grid steps if possible."""
    cap = max(256, min(_round_up(tile_batch, 256), 8192))
    b_ceil = _round_up(batch, 256)
    tb = min(cap, b_ceil)
    # Prefer at least 2 grid steps when the batch allows it so the "parallel"
    # grid axis can shard across both TensorCores on v7x (a single-step grid
    # leaves one TC idle). Costs at most one extra ~0.35us step elsewhere.
    if b_ceil >= 512 and pl.cdiv(batch, tb) < 2:
        tb = min(tb, _round_up(pl.cdiv(b_ceil, 2), 256))
    return tb


def _mlp_kernel(x_ref, w1_ref, b1_ref, w2_ref, b2_ref, o_ref, *, apply_sigmoid):
    # Hidden layer on the MXU: (TB, D) @ (D, H) + (1, H); tanh on the EUP/VPU.
    h = jnp.tanh(
        jnp.dot(x_ref[...], w1_ref[...], preferred_element_type=jnp.float32)
        + b1_ref[...]
    )
    # Output layer (H -> 1), computed directly in lane-dense orientation:
    # (1, H) x (TB, H) contracting over H -> (1, TB). Same contraction pattern
    # as q @ k^T in flash attention, so it lowers cleanly to the MXU and avoids
    # both a (TB,1)->(1,TB) relayout and the masked single-lane store path.
    eta = (
        lax.dot_general(
            w2_ref[...],
            h,
            dimension_numbers=(((1,), (1,)), ((), ())),
            preferred_element_type=jnp.float32,
        )
        + b2_ref[0]
    )
    if apply_sigmoid:
        eta = jax.nn.sigmoid(eta)
    o_ref[...] = eta.astype(o_ref.dtype)


def mlp_propensity_forward(x, w1, b1, w2, b2, sigmoid=False, tile_batch=4096):
    """Forward pass of MLPPropensityEstimator.

    x:  (B, D) float32
    w1: (D, H)   -- transposed vs. torch.nn.Linear's (out, in) layout
    b1: (1, H)
    w2: (H, 1)
    b2: scalar / (1,) / (1, 1)
    returns (B, 1)
    """
    B, D = x.shape
    H = w1.shape[1]

    w2_row = w2.reshape(1, H)        # lane-major row for the in-kernel contraction
    b2 = jnp.asarray(b2).reshape(1)  # 1-D SMEM scalar (2-D SMEM pads to 8x128)

    TB = _choose_tile_batch(B, tile_batch)
    num_tiles = pl.cdiv(B, TB)       # no jnp.pad: partial trailing x block is fine
    B_pad = num_tiles * TB

    kernel = functools.partial(_mlp_kernel, apply_sigmoid=sigmoid)

    cost = pl.CostEstimate(
        flops=2 * B * D * H + 2 * B * H,
        transcendentals=B * H + (B if sigmoid else 0),
        bytes_accessed=(B * D + B + D * H + 2 * H + 1) * 4,
    )

    out = pl.pallas_call(
        kernel,
        out_shape=jax.ShapeDtypeStruct((1, B_pad), x.dtype),
        grid_spec=pltpu.PrefetchScalarGridSpec(
            num_scalar_prefetch=0,
            grid=(num_tiles,),
            in_specs=[
                # x streams through VMEM, one (TB, D) tile per grid step
                # (trailing block may be partial; garbage rows are sliced off).
                pl.BlockSpec((TB, D), lambda i: (i, 0)),
                # Weights / hidden bias stay resident across all grid steps.
                pl.BlockSpec((D, H), lambda i: (0, 0)),
                pl.BlockSpec((1, H), lambda i: (0, 0)),
                pl.BlockSpec((1, H), lambda i: (0, 0)),
                # b2 is a single scalar -> scalar memory, no padded VMEM tile.
                pl.BlockSpec(memory_space=pltpu.MemorySpace.SMEM),
            ],
            # Lane-dense output: one (1, TB) row per grid step.
            out_specs=pl.BlockSpec((1, TB), lambda i: (0, i)),
        ),
        compiler_params=pltpu.CompilerParams(
            # Independent batch tiles -> megacore sharding on v7x.
            dimension_semantics=("parallel",),
            # Generation-safe VMEM budget; tiles stay far below this at TB<=8192.
            vmem_limit_bytes=32 * 1024 * 1024,
        ),
        cost_estimate=cost,
    )(x, w1, b1, w2_row, b2)

    # (1, B_pad) row -> (B, 1) column; drops any garbage trailing rows.
    return out.reshape(-1)[:B].reshape(B, 1)


def _reference(x, w1, b1, w2, b2, sigmoid=False):
    eta = jnp.tanh(x @ w1 + b1) @ w2 + b2
    if sigmoid:
        eta = jax.nn.sigmoid(eta)
    return eta


if __name__ == "__main__":
    # Shapes consistent with the module: batch=8, input_dim=16, hidden_dim=32.
    B, D, H = 8, 16, 32

    key = jax.random.PRNGKey(0)
    kx, kw1, kb1, kw2, kb2, kx2 = jax.random.split(key, 6)

    x = jax.random.normal(kx, (B, D), dtype=jnp.float32)

    # Deterministic parameter init (the original module zero-inits these; we use
    # small random values so the kernel compute path is non-trivial).
    w1 = 0.1 * jax.random.normal(kw1, (D, H), dtype=jnp.float32)
    b1 = 0.1 * jax.random.normal(kb1, (1, H), dtype=jnp.float32)
    w2 = 0.1 * jax.random.normal(kw2, (H, 1), dtype=jnp.float32)
    b2 = 0.1 * jax.random.normal(kb2, (1, 1), dtype=jnp.float32)

    # sigmoid=False path (default forward).
    out = jax.block_until_ready(
        mlp_propensity_forward(x, w1, b1, w2, b2, sigmoid=False)
    )
    ref = _reference(x, w1, b1, w2, b2, sigmoid=False)
    assert out.shape == (B, 1)
    assert jnp.allclose(out, ref, atol=1e-5, rtol=1e-5)

    # sigmoid=True path.
    out_s = jax.block_until_ready(
        mlp_propensity_forward(x, w1, b1, w2, b2, sigmoid=True)
    )
    ref_s = _reference(x, w1, b1, w2, b2, sigmoid=True)
    assert jnp.allclose(out_s, ref_s, atol=1e-5, rtol=1e-5)

    # Multi-tile + ragged-batch path (exercises >=2 grid steps and the partial
    # trailing x block, no wrapper-side padding copy).
    B2 = 600
    x2 = jax.random.normal(kx2, (B2, D), dtype=jnp.float32)
    out2 = jax.block_until_ready(
        mlp_propensity_forward(x2, w1, b1, w2, b2, sigmoid=True)
    )
    ref2 = _reference(x2, w1, b1, w2, b2, sigmoid=True)
    assert out2.shape == (B2, 1)
    assert jnp.allclose(out2, ref2, atol=1e-5, rtol=1e-5)

    # Module-faithful zero-init case (output must be exactly 0 / sigmoid 0.5).
    z_w1 = jnp.zeros((D, H), jnp.float32)
    z_b1 = jnp.zeros((1, H), jnp.float32)
    z_w2 = jnp.zeros((H, 1), jnp.float32)
    z_b2 = jnp.zeros((1, 1), jnp.float32)
    out_z = jax.block_until_ready(
        mlp_propensity_forward(x, z_w1, z_b1, z_w2, z_b2, sigmoid=False)
    )
    assert jnp.allclose(out_z, jnp.zeros((B, 1), jnp.float32))
    out_zs = jax.block_until_ready(
        mlp_propensity_forward(x, z_w1, z_b1, z_w2, z_b2, sigmoid=True)
    )
    assert jnp.allclose(out_zs, 0.5 * jnp.ones((B, 1), jnp.float32))

    print("KERNEL_OK")
</pallas_src>

<mosaic_0001>
module attributes {stable_mosaic.version = 11 : i64} {
  func.func @_mlp_kernel(%arg0: i32, %arg1: memref<256x16xf32, #tpu.memory_space<vmem>>, %arg2: memref<16x32xf32, #tpu.memory_space<vmem>>, %arg3: memref<1x32xf32, #tpu.memory_space<vmem>>, %arg4: memref<1x32xf32, #tpu.memory_space<vmem>>, %arg5: memref<1xf32, #tpu.memory_space<smem>>, %arg6: memref<1x256xf32, #tpu.memory_space<vmem>>) attributes {dimension_semantics = [#tpu.dimension_semantics<parallel>], iteration_bounds = array<i64: 1>, scalar_prefetch = 0 : i64, scratch_operands = 0 : i64, tpu.core_type = #tpu.core_type<tc>, window_params = [{transform_indices = @transform_0, window_bounds = array<i64: 256, 16>}, {pipeline_mode = #tpu.pipeline_mode<synchronous>, transform_indices = @transform_1, window_bounds = array<i64: 16, 32>}, {pipeline_mode = #tpu.pipeline_mode<synchronous>, transform_indices = @transform_2, window_bounds = array<i64: 1, 32>}, {pipeline_mode = #tpu.pipeline_mode<synchronous>, transform_indices = @transform_3, window_bounds = array<i64: 1, 32>}, {transform_indices = @transform_4, window_bounds = array<i64: 1>}, {transform_indices = @transform_5, window_bounds = array<i64: 1, 256>}]} {
    %c0 = arith.constant 0 : index
    %c0_0 = arith.constant 0 : index
    %0 = vector.load %arg1[%c0, %c0_0] : memref<256x16xf32, #tpu.memory_space<vmem>>, vector<256x16xf32>
    %c0_1 = arith.constant 0 : index
    %c0_2 = arith.constant 0 : index
    %1 = vector.load %arg2[%c0_1, %c0_2] : memref<16x32xf32, #tpu.memory_space<vmem>>, vector<16x32xf32>
    %cst = arith.constant dense<0.000000e+00> : vector<256x32xf32>
    %2 = tpu.matmul %0, %1, %cst {dimension_numbers = #tpu.dot_dimension_numbers<[1], [0], [0], [1], [0, 0, 1, 1], [], []>} : vector<256x16xf32>, vector<16x32xf32>, vector<256x32xf32> -> vector<256x32xf32>
    %c0_3 = arith.constant 0 : index
    %c0_4 = arith.constant 0 : index
    %3 = vector.load %arg3[%c0_3, %c0_4] : memref<1x32xf32, #tpu.memory_space<vmem>>, vector<1x32xf32>
    %4 = vector.broadcast %3 : vector<1x32xf32> to vector<256x32xf32>
    %5 = arith.addf %2, %4 : vector<256x32xf32>
    %6 = math.tanh %5 : vector<256x32xf32>
    %c0_5 = arith.constant 0 : index
    %c0_6 = arith.constant 0 : index
    %7 = vector.load %arg4[%c0_5, %c0_6] : memref<1x32xf32, #tpu.memory_space<vmem>>, vector<1x32xf32>
    %cst_7 = arith.constant dense<0.000000e+00> : vector<1x256xf32>
    %8 = tpu.matmul %7, %6, %cst_7 {dimension_numbers = #tpu.dot_dimension_numbers<[1], [1], [0], [0], [0, 0, 1, 0], [], []>} : vector<1x32xf32>, vector<256x32xf32>, vector<1x256xf32> -> vector<1x256xf32>
    %c0_8 = arith.constant 0 : index
    %9 = memref.load %arg5[%c0_8] : memref<1xf32, #tpu.memory_space<smem>>
    %10 = vector.broadcast %9 : f32 to vector<1x256xf32>
    %11 = arith.addf %8, %10 : vector<1x256xf32>
    %c0_9 = arith.constant 0 : index
    %c0_10 = arith.constant 0 : index
    %12 = vector.load %arg6[%c0_9, %c0_10] : memref<1x256xf32, #tpu.memory_space<vmem>>, vector<1x256xf32>
    tpu.vector_store %arg6[%c0_9, %c0_10], %11 {strides = array<i32>} : memref<1x256xf32, #tpu.memory_space<vmem>>, vector<1x256xf32>,
    return
  }
  func.func @transform_0(%arg0: i32) -> (i32, i32) {
    %c0_i32 = arith.constant 0 : i32
    %c0_i32_0 = arith.constant 0 : i32
    return %arg0, %c0_i32 : i32, i32
  }
  func.func @transform_1(%arg0: i32) -> (i32, i32) {
    %c0_i32 = arith.constant 0 : i32
    %c0_i32_0 = arith.constant 0 : i32
    %c0_i32_1 = arith.constant 0 : i32
    return %c0_i32, %c0_i32_0 : i32, i32
  }
  func.func @transform_2(%arg0: i32) -> (i32, i32) {
    %c0_i32 = arith.constant 0 : i32
    %c0_i32_0 = arith.constant 0 : i32
    %c0_i32_1 = arith.constant 0 : i32
    return %c0_i32, %c0_i32_0 : i32, i32
  }
  func.func @transform_3(%arg0: i32) -> (i32, i32) {
    %c0_i32 = arith.constant 0 : i32
    %c0_i32_0 = arith.constant 0 : i32
    %c0_i32_1 = arith.constant 0 : i32
    return %c0_i32, %c0_i32_0 : i32, i32
  }
  func.func @transform_4(%arg0: i32) -> i32 {
    %c0_i32 = arith.constant 0 : i32
    %c0_i32_0 = arith.constant 0 : i32
    return %c0_i32 : i32
  }
  func.func @transform_5(%arg0: i32) -> (i32, i32) {
    %c0_i32 = arith.constant 0 : i32
    %c0_i32_0 = arith.constant 0 : i32
    return %c0_i32, %arg0 : i32, i32
  }
}

</mosaic_0001>

<bundles_post_ra>
// kernel: tpu_custom_call.1
= control target key start
LH: loop header
LB: loop body
LE: loop exit
PB: predicated region body
PF: predicated region fallthrough
CT: control target
= control target key end

     0   :  { %11 = vsyncpa [#allocation4], 0  ;;  %s1301_s0 = inlined_call_operand.hbm [shape: f32[8,16], index: 0, kind: input, shape index: {}]   ;;  %s1302_s1 = inlined_call_operand.hbm [shape: f32[16,32], index: 1, kind: input, shape index: {}]   ;;  %s1303_s2 = inlined_call_operand.vmem [shape: f32[1,32], index: 2, kind: input, shape index: {}]   ;;  %s1304_s3 = inlined_call_operand.vmem [shape: f32[1,32], index: 3, kind: input, shape index: {}]   ;;  %s1305_s4 = inlined_call_operand.<no memory space> [shape: f32[1], index: 4, kind: input, shape index: {}]   ;;  %s1306_s5 = inlined_call_operand.hbm [shape: f32[1,256], index: 5, kind: output, shape index: {}]  }
   0x1   :  { %12 = vsyncpa [#allocation7], 0 }
   0x2   :  { %13 = vsyncpa [#allocation5], 0 }
   0x3   :  { %18 = vsyncadd [#allocation4], 3968  ;;  %s1038_s18 = smov [#allocation3]   ;;  %s966_s22 = scalar_lea.hbm %s1301_s0, 128 }
   0x4   :  { %s19_s19 = sshll.u32 %s1038_s18, 4  ;;  %p967_p0 = scmp.ne.s32.totalorder %s1301_s0, %s966_s22  ;;  %s20_s19 = int_to_ptr.vmem [resolvable:$true] %s19_s19 }
   0x5   :  { %p970_p1 = scmp.lt.u32.totalorder %s966_s22, %s1301_s0 }
   0x7   :  { %p972_p2 = pnand %p970_p1, %p967_p0 }
   0x9   :  { %975 = shalt.err (!%p972_p2)
}
   0xa   :  { %s976_s27 = scalar_lea.vmem %s20_s19, 128  ;;  %s980_s28 = scalar_lea.vmem %s20_s19, 4096 }
   0xb   :  { %p977_p3 = scmp.ne.s32.totalorder %s20_s19, %s976_s27  ;;  %p981_p4 = scmp.lt.s32.totalorder %s20_s19, %s20_s19 }
   0xc   :  { %p982_p5 = scmp.lt.s32.totalorder %s980_s28, %s976_s27 }
   0xe   :  { %p983_p6 = por %p982_p5, %p981_p4 }
  0x10   :  { %p984_p7 = pnand %p983_p6, %p977_p3 }
  0x12   :  { %987 = shalt.err (!%p984_p7)
}
  0x13   :  { %s1039_s29 = smov 128   ;;  %s1040_s30 = smov 8  }
  0x14   :  { %25 = dma.hbm_to_vmem [thread:$0]  %s1301_s0, 128, %s20_s19, [#allocation4], %s1039_s29, %s1039_s29, %s1040_s30  }
  0x15   :  { %s1041_s8 = smov [#allocation6]   ;;  %s988_s12 = scalar_lea.hbm %s1302_s1, 256 }
  0x16   :  { %s31_s9 = sshll.u32 %s1041_s8, 4  ;;  %p989_p8 = scmp.ne.s32.totalorder %s1302_s1, %s988_s12  ;;  %s32_s9 = int_to_ptr.vmem [resolvable:$true] %s31_s9 }
  0x17   :  { %p992_p9 = scmp.lt.u32.totalorder %s988_s12, %s1302_s1 }
  0x19   :  { %p994_p10 = pnand %p992_p9, %p989_p8 }
  0x1b   :  { %997 = shalt.err (!%p994_p10)
}
  0x1c   :  { %s998_s17 = scalar_lea.vmem %s32_s9, 256  ;;  %p1003_p12 = scmp.lt.s32.totalorder %s32_s9, %s32_s9 }
  0x1d   :  { %p999_p11 = scmp.ne.s32.totalorder %s32_s9, %s998_s17  ;;  %p1004_p13 = scmp.lt.s32.totalorder %s998_s17, %s998_s17 }
  0x1f   :  { %p1005_p0 = por %p1004_p13, %p1003_p12 }
  0x21   :  { %p1006_p1 = pnand %p1005_p0, %p999_p11 }
  0x23   :  { %1009 = shalt.err (!%p1006_p1)
}
  0x24   :  { %37 = dma.hbm_to_vmem [thread:$0]  %s1302_s1, 256, %s32_s9, [#allocation7], %s1039_s29, %s1039_s29, %s1040_s30  }
  0x25   :  { %1032 = dma.done.wait [#allocation4], 4096  }
  0x26   :  { %1033 = vsyncadd [#allocation4], 4294963200 }
  0x27   :  { %1034 = dma.done.wait [#allocation7], 256  }
  0x28   :  { %1035 = vsyncadd [#allocation7], 4294967040  ;;  %vm91_vm0 = vcmask 130048   ;;  %v82_v0 = vld [vmem:[#allocation6] sm:$0xff]  ;;  %v83_v1 = vld [vmem:[#allocation6 + $0x8] sm:$0xff]  ;;  %vm448_vm1 = vcmask 261120  }
  0x29   :  { %v50_v2 = vld [vmem:[#allocation3] sm:$0xff]  ;;  %v844_v3 = vpack.c.bf16 %v83_v1, %v82_v0  ;;  %v51_v4 = vld [vmem:[#allocation3 + $0x8] sm:$0xff]  ;;  %v52_v5 = vld [vmem:[#allocation3 + $0x10] sm:$0xff]  ;;  %s1043_s22 = smov [#allocation8]  }
  0x2a   :  { %796 = vmatprep.mubr.msk.f32.mxu0 %vm91_vm0, %v50_v2  ;;  %v53_v6 = vld [vmem:[#allocation3 + $0x18] sm:$0xff]  ;;  %v54_v7 = vld [vmem:[#allocation3 + $0x20] sm:$0xff]  ;;  %v55_v8 = vld [vmem:[#allocation3 + $0x28] sm:$0xff]  ;;  %s648_s23 = sshll.u32 %s1043_s22, 4  ;;  %s649_s23 = int_to_ptr.vmem [resolvable:$true] %s648_s23 }
  0x2b   :  { %845 = vmatprep.subr.bf16.mxu0 %v844_v3  ;;  %v56_v9 = vld [vmem:[#allocation3 + $0x30] sm:$0xff]  ;;  %v57_v10 = vld [vmem:[#allocation3 + $0x38] sm:$0xff]  ;;  %v58_v11 = vld [vmem:[#allocation3 + $0x40] sm:$0xff]  ;;  %s1010_s24 = scalar_lea.vmem %s649_s23, 32  ;;  %p1015_p3 = scmp.lt.s32.totalorder %s649_s23, %s649_s23 }
  0x2c   :  { %847 = vmatpush3.bf16.msra.mxu0 %v844_v3  ;;  %v59_v12 = vld [vmem:[#allocation3 + $0x48] sm:$0xff]  ;;  %v60_v13 = vld [vmem:[#allocation3 + $0x50] sm:$0xff]  ;;  %v61_v14 = vld [vmem:[#allocation3 + $0x58] sm:$0xff]  ;;  %p1011_p2 = scmp.ne.s32.totalorder %s649_s23, %s1010_s24  ;;  %p1016_p4 = scmp.lt.s32.totalorder %s1010_s24, %s1010_s24 }
  0x2d   :  { %v62_v15 = vld [vmem:[#allocation3 + $0x60] sm:$0xff]  ;;  %v63_v16 = vld [vmem:[#allocation3 + $0x68] sm:$0xff]  ;;  %v64_v17 = vld [vmem:[#allocation3 + $0x70] sm:$0xff] }
  0x2e   :  { %v65_v18 = vld [vmem:[#allocation3 + $0x78] sm:$0xff]  ;;  %v66_v19 = vld [vmem:[#allocation3 + $0x80] sm:$0xff]  ;;  %v67_v20 = vld [vmem:[#allocation3 + $0x88] sm:$0xff]  ;;  %p1017_p5 = por %p1016_p4, %p1015_p3 }
  0x2f   :  { %797 = vmatmul.mubr.msk.f32.vlgmr.msra.gmra.mrb[0].mxu0 %vm91_vm0, %v51_v4  ;;  %v68_v21 = vld [vmem:[#allocation3 + $0x90] sm:$0xff]  ;;  %v69_v22 = vld [vmem:[#allocation3 + $0x98] sm:$0xff]  ;;  %v70_v23 = vld [vmem:[#allocation3 + $0xa0] sm:$0xff] }
  0x30   :  { %799 = vmatprep.mubr.msk.f32.mxu0 %vm91_vm0, %v52_v5  ;;  %v71_v24 = vld [vmem:[#allocation3 + $0xa8] sm:$0xff]  ;;  %v72_v25 = vld [vmem:[#allocation3 + $0xb0] sm:$0xff]  ;;  %v73_v26 = vld [vmem:[#allocation3 + $0xb8] sm:$0xff]  ;;  %p1018_p6 = pnand %p1017_p5, %p1011_p2 }
  0x31   :  { %v74_v27 = vld [vmem:[#allocation3 + $0xc0] sm:$0xff]  ;;  %v75_v28 = vld [vmem:[#allocation3 + $0xc8] sm:$0xff]  ;;  %v76_v29 = vld [vmem:[#allocation3 + $0xd0] sm:$0xff] }
  0x32   :  { %v77_v30 = vld [vmem:[#allocation3 + $0xd8] sm:$0xff]  ;;  %v78_v31 = vld [vmem:[#allocation3 + $0xe0] sm:$0xff]  ;;  %v79_v32 = vld [vmem:[#allocation3 + $0xe8] sm:$0xff] }
  0x33   :  { %800 = vmatmul.mubr.msk.f32.gmra.mrb[2].mxu0 %vm91_vm0, %v53_v6  ;;  %v80_v33 = vld [vmem:[#allocation3 + $0xf0] sm:$0xff]  ;;  %v81_v34 = vld [vmem:[#allocation3 + $0xf8] sm:$0xff]  ;;  %v1133_v35 = vld [vmem:[%s1304_s3] sm:$0x1] }
  0x34   :  { %802 = vmatprep.mubr.msk.f32.mxu0 %vm91_vm0, %v54_v7  ;;  %790 = vmatprep.mubr.msk.f32.mxu1 %vm448_vm1, %v1133_v35  ;;  %v1140_v36 = vld [vmem:[%s1303_s2] ss:$0 sm:$0xff]  ;;  %vm1215_vm2 = vmpackc.low %vm448_vm1, %vm448_vm1 }
  0x37   :  { %803 = vmatmul.mubr.msk.f32.gmra.mrb[4].mxu0 %vm91_vm0, %v55_v8 }
  0x38   :  { %805 = vmatprep.mubr.msk.f32.mxu0 %vm91_vm0, %v56_v9 }
  0x3b   :  { %806 = vmatmul.mubr.msk.f32.gmra.mrb[6].mxu0 %vm91_vm0, %v57_v10 }
  0x3c   :  { %808 = vmatprep.mubr.msk.f32.mxu0 %vm91_vm0, %v58_v11 }
  0x3f   :  { %809 = vmatmul.mubr.msk.f32.gmra.mrb[8].mxu0 %vm91_vm0, %v59_v12 }
  0x40   :  { %811 = vmatprep.mubr.msk.f32.mxu0 %vm91_vm0, %v60_v13 }
  0x43   :  { %812 = vmatmul.mubr.msk.f32.gmra.mrb[10].mxu0 %vm91_vm0, %v61_v14 }
  0x44   :  { %814 = vmatprep.mubr.msk.f32.mxu0 %vm91_vm0, %v62_v15 }
  0x47   :  { %815 = vmatmul.mubr.msk.f32.gmra.mrb[12].mxu0 %vm91_vm0, %v63_v16 }
  0x48   :  { %817 = vmatprep.mubr.msk.f32.mxu0 %vm91_vm0, %v64_v17 }
  0x4b   :  { %818 = vmatmul.mubr.msk.f32.gmra.mrb[14].mxu0 %vm91_vm0, %v65_v18 }
  0x4c   :  { %820 = vmatprep.mubr.msk.f32.mxu0 %vm91_vm0, %v66_v19 }
  0x4f   :  { %821 = vmatmul.mubr.msk.f32.gmra.mrb[16].mxu0 %vm91_vm0, %v67_v20 }
  0x50   :  { %823 = vmatprep.mubr.msk.f32.mxu0 %vm91_vm0, %v68_v21 }
  0x53   :  { %824 = vmatmul.mubr.msk.f32.gmra.mrb[18].mxu0 %vm91_vm0, %v69_v22 }
  0x54   :  { %826 = vmatprep.mubr.msk.f32.mxu0 %vm91_vm0, %v70_v23 }
  0x57   :  { %827 = vmatmul.mubr.msk.f32.gmra.mrb[20].mxu0 %vm91_vm0, %v71_v24 }
  0x58   :  { %829 = vmatprep.mubr.msk.f32.mxu0 %vm91_vm0, %v72_v25 }
  0x5b   :  { %830 = vmatmul.mubr.msk.f32.gmra.mrb[22].mxu0 %vm91_vm0, %v73_v26 }
  0x5c   :  { %832 = vmatprep.mubr.msk.f32.mxu0 %vm91_vm0, %v74_v27 }
  0x5f   :  { %833 = vmatmul.mubr.msk.f32.gmra.mrb[24].mxu0 %vm91_vm0, %v75_v28 }
  0x60   :  { %835 = vmatprep.mubr.msk.f32.mxu0 %vm91_vm0, %v76_v29 }
  0x63   :  { %836 = vmatmul.mubr.msk.f32.gmra.mrb[26].mxu0 %vm91_vm0, %v77_v30 }
  0x64   :  { %838 = vmatprep.mubr.msk.f32.mxu0 %vm91_vm0, %v78_v31 }
  0x67   :  { %839 = vmatmul.mubr.msk.f32.gmra.mrb[28].mxu0 %vm91_vm0, %v79_v32 }
  0x68   :  { %841 = vmatprep.mubr.msk.f32.mxu0 %vm91_vm0, %v80_v33 }
  0x6b   :  { %842 = vmatmul.mubr.msk.f32.gmra.mrb[30].mxu0 %vm91_vm0, %v81_v34 }
 0x102   :  { %v798_v37 = vpop.f32.mrb[0].mxu0 }
 0x103   :  { %v260_v38 = vadd.f32 %v798_v37, %v1140_v36  ;;  %v254_v39 = vpop.f32.mrb[1].mxu0 }
 0x104   :  { %v255_v40 = vadd.f32 %v1140_v36, %v254_v39 }
 0x105   :  { %902 = vtanh.f32 %v260_v38 }
 0x106   :  { %904 = vtanh.f32 %v255_v40  ;;  %v801_v41 = vpop.f32.mrb[2].mxu0 }
 0x107   :  { %v270_v42 = vadd.f32 %v801_v41, %v1140_v36  ;;  %v264_v43 = vpop.f32.mrb[3].mxu0 }
 0x108   :  { %v265_v44 = vadd.f32 %v1140_v36, %v264_v43 }
 0x109   :  { %906 = vtanh.f32 %v270_v42 }
 0x10a   :  { %908 = vtanh.f32 %v265_v44  ;;  %v804_v45 = vpop.f32.mrb[4].mxu0 }
 0x10b   :  { %v280_v46 = vadd.f32 %v804_v45, %v1140_v36  ;;  %v274_v47 = vpop.f32.mrb[5].mxu0 }
 0x10c   :  { %v275_v48 = vadd.f32 %v1140_v36, %v274_v47 }
 0x10d   :  { %910 = vtanh.f32 %v280_v46 }
 0x10e   :  { %912 = vtanh.f32 %v275_v48  ;;  %v807_v49 = vpop.f32.mrb[6].mxu0 }
 0x10f   :  { %v1148_v50 = vpop.eup %902  ;;  %v290_v51 = vadd.f32 %v807_v49, %v1140_v36  ;;  %v284_v52 = vpop.f32.mrb[7].mxu0 }
 0x110   :  { %v1151_v53 = vpop.eup %904  ;;  %v285_v54 = vadd.f32 %v1140_v36, %v284_v52 }
 0x111   :  { %914 = vtanh.f32 %v290_v51  ;;  %v851_v55 = vpack.c.bf16 %v1148_v50, %v1151_v53 }
 0x112   :  { %916 = vtanh.f32 %v285_v54  ;;  %v810_v56 = vpop.f32.mrb[8].mxu0 }
 0x113   :  { %v1156_v57 = vpop.eup %906  ;;  %v300_v58 = vadd.f32 %v810_v56, %v1140_v36  ;;  %v294_v59 = vpop.f32.mrb[9].mxu0 }
 0x114   :  { %v1159_v60 = vpop.eup %908  ;;  %v295_v61 = vadd.f32 %v1140_v36, %v294_v59 }
 0x115   :  { %918 = vtanh.f32 %v300_v58  ;;  %v857_v62 = vpack.c.bf16 %v1156_v57, %v1159_v60 }
 0x116   :  { %920 = vtanh.f32 %v295_v61  ;;  %v813_v63 = vpop.f32.mrb[10].mxu0 }
 0x117   :  { %v1164_v0 = vpop.eup %910  ;;  %v310_v1 = vadd.f32 %v813_v63, %v1140_v36  ;;  %v304_v2 = vpop.f32.mrb[11].mxu0 }
 0x118   :  { %v1167_v3 = vpop.eup %912  ;;  %v305_v4 = vadd.f32 %v1140_v36, %v304_v2 }
 0x119   :  { %922 = vtanh.f32 %v310_v1  ;;  %v863_v5 = vpack.c.bf16 %v1164_v0, %v1167_v3  ;;  %v1042_v3 = vmov 1966171168  }
 0x11a   :  { %924 = vtanh.f32 %v305_v4  ;;  %v816_v6 = vpop.f32.mrb[12].mxu0 }
 0x11b   :  { %v1172_v7 = vpop.eup %914  ;;  %v320_v8 = vadd.f32 %v816_v6, %v1140_v36  ;;  %v314_v9 = vpop.f32.mrb[13].mxu0 }
 0x11c   :  { %v1175_v10 = vpop.eup %916  ;;  %v315_v11 = vadd.f32 %v1140_v36, %v314_v9 }
 0x11d   :  { %926 = vtanh.f32 %v320_v8  ;;  %v869_v12 = vpack.c.bf16 %v1172_v7, %v1175_v10  ;;  %v625_v7 = vlaneseq  ;;  %v447_v10 = vstv %s1305_s4 }
 0x11e   :  { %928 = vtanh.f32 %v315_v11  ;;  %v819_v13 = vpop.f32.mrb[14].mxu0 }
 0x11f   :  { %v1180_v14 = vpop.eup %918  ;;  %v330_v15 = vadd.f32 %v819_v13, %v1140_v36  ;;  %v324_v16 = vpop.f32.mrb[15].mxu0  ;;  %vm639_vm3 = vcmp.lt.s32.totalorder %v625_v7, 256 }
 0x120   :  { %v1183_v17 = vpop.eup %920  ;;  %v325_v18 = vadd.f32 %v1140_v36, %v324_v16 }
 0x121   :  { %930 = vtanh.f32 %v330_v15  ;;  %v875_v19 = vpack.c.bf16 %v1180_v14, %v1183_v17  ;;  %v626_v14 = vshrl.u32 %v625_v7, 7 }
 0x122   :  { %932 = vtanh.f32 %v325_v18  ;;  %v822_v20 = vpop.f32.mrb[16].mxu0 }
 0x123   :  { %v1188_v21 = vpop.eup %922  ;;  %v340_v22 = vadd.f32 %v822_v20, %v1140_v36  ;;  %v334_v23 = vpop.f32.mrb[17].mxu0 }
 0x124   :  { %v1191_v24 = vpop.eup %924  ;;  %v335_v25 = vadd.f32 %v1140_v36, %v334_v23 }
 0x125   :  { %934 = vtanh.f32 %v340_v22  ;;  %v881_v26 = vpack.c.bf16 %v1188_v21, %v1191_v24 }
 0x126   :  { %936 = vtanh.f32 %v335_v25  ;;  %v825_v27 = vpop.f32.mrb[18].mxu0 }
 0x127   :  { %v1196_v28 = vpop.eup %926  ;;  %v350_v29 = vadd.f32 %v825_v27, %v1140_v36  ;;  %v344_v30 = vpop.f32.mrb[19].mxu0 }
 0x128   :  { %v1199_v31 = vpop.eup %928  ;;  %v345_v32 = vadd.f32 %v1140_v36, %v344_v30 }
 0x129   :  { %938 = vtanh.f32 %v350_v29  ;;  %v887_v33 = vpack.c.bf16 %v1196_v28, %v1199_v31 }
 0x12a   :  { %940 = vtanh.f32 %v345_v32  ;;  %v828_v34 = vpop.f32.mrb[20].mxu0 }
 0x12b   :  { %v1204_v37 = vpop.eup %930  ;;  %v360_v38 = vadd.f32 %v828_v34, %v1140_v36  ;;  %v354_v39 = vpop.f32.mrb[21].mxu0 }
 0x12c   :  { %v1207_v40 = vpop.eup %932  ;;  %v355_v41 = vadd.f32 %v1140_v36, %v354_v39 }
 0x12d   :  { %942 = vtanh.f32 %v360_v38  ;;  %v893_v42 = vpack.c.bf16 %v1204_v37, %v1207_v40 }
 0x12e   :  { %944 = vtanh.f32 %v355_v41  ;;  %v831_v43 = vpop.f32.mrb[22].mxu0 }
 0x12f   :  { %v935_v44 = vpop.eup %934  ;;  %v370_v45 = vadd.f32 %v831_v43, %v1140_v36  ;;  %v364_v46 = vpop.f32.mrb[23].mxu0 }
 0x130   :  { %v937_v47 = vpop.eup %936  ;;  %v365_v49 = vadd.f32 %v1140_v36, %v364_v46 }
 0x131   :  { %v848_v51 = vpack.c.bf16 %v935_v44, %v937_v47  ;;  %946 = vtanh.f32 %v370_v45 }
 0x132   :  { %948 = vtanh.f32 %v365_v49  ;;  %v834_v52 = vpop.f32.mrb[24].mxu0 }
 0x133   :  { %v939_v54 = vpop.eup %938  ;;  %850 = vmatprep.subr.msk.bf16.mxu1 %vm1215_vm2, %v848_v51  ;;  %v380_v56 = vadd.f32 %v834_v52, %v1140_v36  ;;  %v374_v58 = vpop.f32.mrb[25].mxu0 }
 0x134   :  { %v941_v59 = vpop.eup %940  ;;  %853 = vmatpush3.bf16.xpose.msk.msra.mxu1 %vm1215_vm2, %v851_v55  ;;  %v375_v61 = vadd.f32 %v1140_v36, %v374_v58 }
 0x135   :  { %v854_v63 = vpack.c.bf16 %v939_v54, %v941_v59  ;;  %950 = vtanh.f32 %v380_v56 }
 0x136   :  { %952 = vtanh.f32 %v375_v61  ;;  %v837_v1 = vpop.f32.mrb[26].mxu0 }
 0x137   :  { %v943_v2 = vpop.eup %942  ;;  %856 = vmatprep.subr.msk.bf16.mxu1 %vm1215_vm2, %v854_v63  ;;  %v390_v4 = vadd.f32 %v837_v1, %v1140_v36  ;;  %v384_v6 = vpop.f32.mrb[27].mxu0 }
 0x138   :  { %v945_v8 = vpop.eup %944  ;;  %v385_v9 = vadd.f32 %v1140_v36, %v384_v6 }
 0x139   :  { %v860_v50 = vpack.c.bf16 %v943_v2, %v945_v8  ;;  %954 = vtanh.f32 %v390_v4 }
 0x13a   :  { %956 = vtanh.f32 %v385_v9  ;;  %v840_v53 = vpop.f32.mrb[28].mxu0 }
 0x13b   :  { %v947_v55 = vpop.eup %946  ;;  %v400_v11 = vadd.f32 %v840_v53, %v1140_v36  ;;  %v394_v13 = vpop.f32.mrb[29].mxu0 }
 0x13c   :  { %v949_v15 = vpop.eup %948  ;;  %859 = vmatpush3.bf16.xpose.msk.msra.mxu1 %vm1215_vm2, %v857_v62  ;;  %v395_v16 = vadd.f32 %v1140_v36, %v394_v13 }
 0x13d   :  { %862 = vmatprep.subr.msk.bf16.mxu1 %vm1215_vm2, %v860_v50  ;;  %v866_v18 = vpack.c.bf16 %v947_v55, %v949_v15  ;;  %958 = vtanh.f32 %v400_v11 }
 0x13e   :  { %960 = vtanh.f32 %v395_v16  ;;  %v843_v20 = vpop.f32.mrb[30].mxu0 }
 0x13f   :  { %v951_v22 = vpop.eup %950  ;;  %v410_v23 = vadd.f32 %v843_v20, %v1140_v36  ;;  %v404_v25 = vpop.f32.mrb[31].mxu0 }
 0x140   :  { %v953_v27 = vpop.eup %952  ;;  %v405_v29 = vadd.f32 %v1140_v36, %v404_v25 }
 0x141   :  { %v872_v57 = vpack.c.bf16 %v951_v22, %v953_v27  ;;  %962 = vtanh.f32 %v410_v23 }
 0x142   :  { %964 = vtanh.f32 %v405_v29 }
 0x143   :  { %v955_v60 = vpop.eup %954 }
 0x144   :  { %v957_v62 = vpop.eup %956  ;;  %865 = vmatpush3.bf16.xpose.msk.msra.mxu1 %vm1215_vm2, %v863_v5  ;;  %v623_v5 = vunpack.c.l.s4 %v1042_v3 }
 0x145   :  { %868 = vmatprep.subr.msk.bf16.mxu1 %vm1215_vm2, %v866_v18  ;;  %v878_v30 = vpack.c.bf16 %v955_v60, %v957_v62 }
 0x147   :  { %v959_v32 = vpop.eup %958 }
 0x148   :  { %v961_v34 = vpop.eup %960 }
 0x149   :  { %v884_v38 = vpack.c.bf16 %v959_v32, %v961_v34 }
 0x14b   :  { %v963_v39 = vpop.eup %962 }
 0x14c   :  { %v965_v36 = vpop.eup %964  ;;  %871 = vmatpush3.bf16.xpose.msk.msra.mxu1 %vm1215_vm2, %v869_v12  ;;  %v624_v12 = vunpack.c.0.s8 %v623_v5 }
 0x14d   :  { %874 = vmatprep.subr.msk.bf16.mxu1 %vm1215_vm2, %v872_v57  ;;  %v890_v0 = vpack.c.bf16 %v963_v39, %v965_v36 }
 0x154   :  { %877 = vmatpush3.bf16.xpose.msk.msra.mxu1 %vm1215_vm2, %v875_v19 }
 0x155   :  { %880 = vmatprep.subr.msk.bf16.mxu1 %vm1215_vm2, %v878_v30 }
 0x15c   :  { %883 = vmatpush3.bf16.xpose.msk.msra.mxu1 %vm1215_vm2, %v881_v26  ;;  %v627_v26 = vsub.s32 %v624_v12, %v626_v14 }
 0x15d   :  { %886 = vmatprep.subr.msk.bf16.mxu1 %vm1215_vm2, %v884_v38 }
 0x164   :  { %889 = vmatpush3.bf16.xpose.msk.msra.mxu1 %vm1215_vm2, %v887_v33 }
 0x165   :  { %892 = vmatprep.subr.msk.bf16.mxu1 %vm1215_vm2, %v890_v0 }
 0x16c   :  { %895 = vmatpush3.bf16.xpose.msk.msra.mxu1 %vm1215_vm2, %v893_v42 }
 0x173   :  { %791 = vmatmul.mubr.msk.f32.vlgmr.msra.gmra.mrb[0].mxu1 %vm448_vm1, %v1133_v35 }
 0x246   :  { %v614_v17 = vpop.f32.mrb[0].mxu1 }
 0x247   :  { %v615_v19 = vadd.f32 %v614_v17, %v447_v10  ;;  %v616_v21 = vpop.f32.mrb[1].mxu1 }
 0x248   :  { %v617_v24 = vadd.f32 %v616_v21, %v447_v10 }
 0x24a   :  { %v621_v28 = vcombine.low %v615_v19, %v617_v24 }
 0x24c   :  { %v628_v31 = vrot.slane %v621_v28, %v627_v26 }
 0x24e   :  { %v635_v35 = vrot.slane %v628_v31, %v627_v26 }
 0x250   :  { %641 = vst.msk [vmem:[#allocation8] sm:$0x3] %vm639_vm3, %v635_v35 }
 0x251   :  { %1021 = shalt.err (!%p1018_p6)
}
 0x252   :  { %s1022_s26 = scalar_lea.hbm %s1306_s5, 32 }
 0x253   :  { %p1023_p7 = scmp.ne.s32.totalorder %s1306_s5, %s1022_s26  ;;  %p1026_p8 = scmp.lt.u32.totalorder %s1022_s26, %s1306_s5 }
 0x255   :  { %p1028_p9 = pnand %p1026_p8, %p1023_p7 }
 0x257   :  { %1031 = shalt.err (!%p1028_p9)
}
 0x258   :  { %651 = dma.vmem_to_hbm [thread:$0]  %s649_s23, 32, %s1306_s5, [#allocation5]  }
 0x259   :  { %1036 = dma.done.wait [#allocation5], 32  }
 0x25a   :  { %1037 = vsyncadd [#allocation5], 4294967264 }
 0x25b   :  { %655 = vsyncpa [#allocation4], 1 }
 0x25c   :  { %656 = vsyncpa [#allocation7], 1 }
 0x25d   :  { %657 = vsyncpa [#allocation5], 1 }

</bundles_post_ra>
